<compile_context>
chip_gen: v6e
topology: v6e:2x2x1
jax: 0.10.0
libtpu: 0.0.40
codegen_flags: <defaults>
</compile_context>

<pallas_src>
import jax
import jax.numpy as jnp
from jax.experimental import pallas as pl
from jax.experimental.pallas import tpu as pltpu


def gating_kernel(x12_ref, x1_ref, x2_ref, w1_ref, b1_ref, w2_ref, b2_ref,
                  out_ref, acc_ref, h_ref):
    k = pl.program_id(0)          # layer-1 output tile == layer-2 reduction tile (outer)
    j = pl.program_id(1)          # layer-2 output tile (inner)
    nk = pl.num_programs(0)

    # ---- Layer 1 (once per k sweep, at its first j step) ---------------------
    # h[:, k_tile] = relu([x1|x2]_bf16 @ W1[:, k_tile] + b1[k_tile])
    @pl.when(j == 0)
    def _():
        h = jnp.dot(x12_ref[...], w1_ref[...], preferred_element_type=jnp.float32)
        h_ref[...] = jnp.maximum(h + b1_ref[...], 0.0)

    # ---- Layer 2 partial product: acc[j] += h_k @ W2[k_tile, j_tile] ---------
    @pl.when(k == 0)
    def _():
        acc_ref[j] = jnp.zeros(acc_ref.shape[1:], jnp.float32)

    acc_ref[j] += jnp.dot(h_ref[...].astype(w2_ref.dtype), w2_ref[...],
                          preferred_element_type=jnp.float32)

    # ---- Epilogue on the final reduction sweep: sigmoid gate + gated mix -----
    @pl.when(k == nk - 1)
    def _():
        gate = jax.nn.sigmoid(acc_ref[j] + b2_ref[...])
        x1 = x1_ref[...]
        x2 = x2_ref[...]
        out_ref[...] = (gate * (x1 - x2) + x2).astype(out_ref.dtype)


def _tile_candidates(dim):
    """`dim` itself plus every 128-multiple divisor of `dim`, largest first."""
    cands = [dim]
    t = (dim // 128) * 128
    while t >= 128:
        if t != dim and dim % t == 0:
            cands.append(t)
        t -= 128
    return cands


def _choose_tiles(B, F, block_k, block_n, vmem_limit_bytes):
    """Largest 128-aligned tiles (tk, tn) dividing F that fit the VMEM budget."""
    Bp = max(8, B)                          # sublane padding
    budget = int(0.85 * vmem_limit_bytes)   # leave headroom for compiler scratch

    def fits(tk, tn):
        resident = (Bp * 2 * F * 2               # x12 (bf16), fully resident
                    + (F // tn) * Bp * tn * 4    # accumulator scratch
                    + Bp * tk * 4)               # hidden-tile scratch
        blocks = 2 * (                           # double-buffered blocks
            2 * F * tk * 2                       # W1 column tile (bf16)
            + tk * tn * 2                        # W2 tile (bf16)
            + 2 * Bp * tn * 4                    # x1, x2 epilogue tiles
            + 8 * tk * 4 + 8 * tn * 4            # b1, b2 tiles
            + Bp * tn * 4)                       # output tile
        return resident + blocks <= budget

    for t in _tile_candidates(F):
        tk = block_k if block_k is not None else t
        tn = block_n if block_n is not None else t
        if fits(tk, tn):
            return tk, tn
    # TODO(synk): tile the layer-1 row dimension (2F) with an inner reduction
    # loop when even the smallest 128-aligned column tiles exceed the VMEM
    # budget (very large F, especially on v7x's 64 MiB VMEM).
    smallest = _tile_candidates(F)[-1]
    return (block_k if block_k is not None else smallest,
            block_n if block_n is not None else smallest)


def gating_network_forward(x1, x2, params, *, block_k=None, block_n=None,
                           vmem_limit_bytes=48 * 1024 * 1024):
    """x1, x2: (B, N, H) float32.  params: prepared (w1c, b1, w2, b2)."""
    B, N, H = x1.shape
    F = N * H
    w1c, b1, w2, b2 = params
    assert w1c.shape == (2 * F, F) and w2.shape == (F, F)

    tk, tn = _choose_tiles(B, F, block_k, block_n, vmem_limit_bytes)
    assert F % tk == 0 and F % tn == 0, "tile sizes must divide F"
    nk, nj = F // tk, F // tn

    x1f = x1.reshape(B, F)
    x2f = x2.reshape(B, F)
    # Layer-1 LHS: pre-cast, pre-concatenated [x1 | x2] (tiny: B x 2F bf16).
    x12 = jnp.concatenate([x1f, x2f], axis=-1).astype(jnp.bfloat16)

    out_flat = pl.pallas_call(
        gating_kernel,
        out_shape=jax.ShapeDtypeStruct((B, F), jnp.float32),
        grid_spec=pltpu.PrefetchScalarGridSpec(
            num_scalar_prefetch=0,
            grid=(nk, nj),                  # k (reduction) outer, j (output) inner
            in_specs=[
                pl.BlockSpec((B, 2 * F), lambda k, j: (0, 0)),   # x12 (resident)
                pl.BlockSpec((B, tn), lambda k, j: (0, j)),      # x1 epilogue tile
                pl.BlockSpec((B, tn), lambda k, j: (0, j)),      # x2 epilogue tile
                pl.BlockSpec((2 * F, tk), lambda k, j: (0, k)),  # W1 col tile (1 DMA / k)
                pl.BlockSpec((1, tk), lambda k, j: (0, k)),      # b1 tile
                pl.BlockSpec((tk, tn), lambda k, j: (k, j)),     # W2 tile (1 DMA each)
                pl.BlockSpec((1, tn), lambda k, j: (0, j)),      # b2 tile
            ],
            out_specs=pl.BlockSpec((B, tn), lambda k, j: (0, j)),
            scratch_shapes=[
                pltpu.VMEM((nj, B, tn), jnp.float32),   # per-output-tile accumulators
                pltpu.VMEM((B, tk), jnp.float32),       # current hidden (layer-1) tile
            ],
        ),
        compiler_params=pltpu.CompilerParams(
            # Both axes carry VMEM scratch state (h across j, acc across k).
            dimension_semantics=("arbitrary", "arbitrary"),
            vmem_limit_bytes=vmem_limit_bytes,
        ),
    )(x12, x1f, x2f, w1c, b1, w2, b2)

    return out_flat.reshape(B, N, H)


def init_params(key, num_nodes, horizon):
    """Raw f32 params in the PyTorch-equivalent layout (weights stored (in, out))."""
    F = num_nodes * horizon
    k1, k2, k3, k4 = jax.random.split(key, 4)
    w1 = 0.05 * jax.random.normal(k1, (2 * F, F), dtype=jnp.float32)
    b1 = 0.05 * jax.random.normal(k2, (1, F), dtype=jnp.float32)
    w2 = 0.05 * jax.random.normal(k3, (F, F), dtype=jnp.float32)
    b2 = 0.05 * jax.random.normal(k4, (1, F), dtype=jnp.float32)
    return w1, b1, w2, b2


def prepare_params(w1, b1, w2, b2, *, num_nodes, horizon, weight_dtype=jnp.bfloat16):
    """One-time host-side prep.

    torch.cat([x1, x2], -1).view(B, -1) interleaves per node: [x1[n,:H], x2[n,:H], ...].
    The kernel instead consumes [x1_flat | x2_flat], so reorder W1's rows to match and
    stack them into a single (2F, F) matrix so layer 1 is one fused matmul.  Weight
    matrices are cast to bf16 for streaming (fp8/int8 + scales would halve it again).
    """
    F = num_nodes * horizon
    w1_nodes = w1.reshape(num_nodes, 2, horizon, F)
    w1a = w1_nodes[:, 0].reshape(F, F)            # rows multiplying x1 elements
    w1b = w1_nodes[:, 1].reshape(F, F)            # rows multiplying x2 elements
    w1c = jnp.concatenate([w1a, w1b], axis=0).astype(weight_dtype)   # (2F, F)
    return (w1c,
            b1.reshape(1, F).astype(jnp.float32),
            w2.astype(weight_dtype),
            b2.reshape(1, F).astype(jnp.float32))


def reference_forward(x1, x2, raw_params):
    """Plain-JAX f32 reference mirroring the PyTorch forward (uses the concat)."""
    B, N, H = x1.shape
    F = N * H
    w1, b1, w2, b2 = raw_params
    combined = jnp.concatenate([x1, x2], axis=-1).reshape(B, 2 * F)
    h = jnp.maximum(combined @ w1 + b1, 0.0)
    g = jax.nn.sigmoid(h @ w2 + b2).reshape(B, N, H)
    return g * x1 + (1.0 - g) * x2


if __name__ == "__main__":
    num_nodes, horizon, batch = 16, 16, 4   # F = 256

    key = jax.random.PRNGKey(0)
    kp, kx1, kx2 = jax.random.split(key, 3)
    raw_params = init_params(kp, num_nodes, horizon)
    params = prepare_params(*raw_params, num_nodes=num_nodes, horizon=horizon)

    x1 = jax.random.normal(kx1, (batch, num_nodes, horizon), dtype=jnp.float32)
    x2 = jax.random.normal(kx2, (batch, num_nodes, horizon), dtype=jnp.float32)

    ref = reference_forward(x1, x2, raw_params)

    # Default path: tiles auto-sized to the VMEM budget -> collapses to a single
    # (1, 1) grid step at these sizes (the whole problem fits easily in VMEM).
    out = jax.block_until_ready(gating_network_forward(x1, x2, params))
    assert out.shape == (batch, num_nodes, horizon)
    err = float(jnp.max(jnp.abs(out - ref)))
    # bf16 weight/activation streaming -> loosened tolerance vs the f32 reference.
    assert err < 2e-2, f"single-step path mismatch: max abs err {err}"

    # Also exercise the multi-step (k-outer / j-inner) pipelined path.
    out_tiled = jax.block_until_ready(
        gating_network_forward(x1, x2, params, block_k=128, block_n=128))
    err_t = float(jnp.max(jnp.abs(out_tiled - ref)))
    assert err_t < 2e-2, f"tiled path mismatch: max abs err {err_t}"

    print("KERNEL_OK")
</pallas_src>

<mosaic_0001>
module attributes {stable_mosaic.version = 11 : i64} {
  func.func @gating_kernel(%arg0: i32, %arg1: i32, %arg2: memref<4x512xbf16, #tpu.memory_space<vmem>>, %arg3: memref<4x256xf32, #tpu.memory_space<vmem>>, %arg4: memref<4x256xf32, #tpu.memory_space<vmem>>, %arg5: memref<512x256xbf16, #tpu.memory_space<vmem>>, %arg6: memref<1x256xf32, #tpu.memory_space<vmem>>, %arg7: memref<256x256xbf16, #tpu.memory_space<vmem>>, %arg8: memref<1x256xf32, #tpu.memory_space<vmem>>, %arg9: memref<4x256xf32, #tpu.memory_space<vmem>>, %arg10: memref<1x4x256xf32, #tpu.memory_space<vmem>>, %arg11: memref<4x256xf32, #tpu.memory_space<vmem>>) attributes {dimension_semantics = [#tpu.dimension_semantics<arbitrary>, #tpu.dimension_semantics<arbitrary>], iteration_bounds = array<i64: 1, 1>, scalar_prefetch = 0 : i64, scratch_operands = 2 : i64, tpu.core_type = #tpu.core_type<tc>, window_params = [{pipeline_mode = #tpu.pipeline_mode<synchronous>, transform_indices = @transform_0, window_bounds = array<i64: 4, 512>}, {transform_indices = @transform_1, window_bounds = array<i64: 4, 256>}, {transform_indices = @transform_2, window_bounds = array<i64: 4, 256>}, {transform_indices = @transform_3, window_bounds = array<i64: 512, 256>}, {transform_indices = @transform_4, window_bounds = array<i64: 1, 256>}, {transform_indices = @transform_5, window_bounds = array<i64: 256, 256>}, {transform_indices = @transform_6, window_bounds = array<i64: 1, 256>}, {transform_indices = @transform_7, window_bounds = array<i64: 4, 256>}]} {
    %c0_i32 = arith.constant 0 : i32
    %0 = arith.cmpi eq, %arg1, %c0_i32 : i32
    %1 = arith.extui %0 : i1 to i32
    %c0_i32_0 = arith.constant 0 : i32
    %2 = arith.cmpi ne, %1, %c0_i32_0 : i32
    scf.if %2 {
      %c0_12 = arith.constant 0 : index
      %c0_13 = arith.constant 0 : index
      %21 = vector.load %arg2[%c0_12, %c0_13] : memref<4x512xbf16, #tpu.memory_space<vmem>>, vector<4x512xbf16>
      %c0_14 = arith.constant 0 : index
      %c0_15 = arith.constant 0 : index
      %22 = vector.load %arg5[%c0_14, %c0_15] : memref<512x256xbf16, #tpu.memory_space<vmem>>, vector<512x256xbf16>
      %cst_16 = arith.constant dense<0.000000e+00> : vector<4x256xf32>
      %23 = tpu.matmul %21, %22, %cst_16 {dimension_numbers = #tpu.dot_dimension_numbers<[1], [0], [0], [1], [0, 0, 1, 1], [], []>} : vector<4x512xbf16>, vector<512x256xbf16>, vector<4x256xf32> -> vector<4x256xf32>
      %c0_17 = arith.constant 0 : index
      %c0_18 = arith.constant 0 : index
      %24 = vector.load %arg6[%c0_17, %c0_18] : memref<1x256xf32, #tpu.memory_space<vmem>>, vector<1x256xf32>
      %25 = vector.broadcast %24 : vector<1x256xf32> to vector<4x256xf32>
      %26 = arith.addf %23, %25 : vector<4x256xf32>
      %cst_19 = arith.constant 0.000000e+00 : f32
      %27 = vector.broadcast %cst_19 : f32 to vector<4x256xf32>
      %28 = arith.maximumf %26, %27 : vector<4x256xf32>
      %c0_20 = arith.constant 0 : index
      %c0_21 = arith.constant 0 : index
      %29 = vector.load %arg11[%c0_20, %c0_21] : memref<4x256xf32, #tpu.memory_space<vmem>>, vector<4x256xf32>
      tpu.vector_store %arg11[%c0_20, %c0_21], %28 {strides = array<i32>} : memref<4x256xf32, #tpu.memory_space<vmem>>, vector<4x256xf32>,
    } else {
    }
    %c0_i32_1 = arith.constant 0 : i32
    %3 = arith.cmpi eq, %arg0, %c0_i32_1 : i32
    %4 = arith.extui %3 : i1 to i32
    %c0_i32_2 = arith.constant 0 : i32
    %5 = arith.cmpi ne, %4, %c0_i32_2 : i32
    scf.if %5 {
      %cst_12 = arith.constant 0.000000e+00 : f32
      %21 = vector.broadcast %cst_12 : f32 to vector<4x256xf32>
      %22 = arith.index_cast %arg1 : i32 to index
      %c0_13 = arith.constant 0 : index
      %c0_14 = arith.constant 0 : index
      %23 = vector.load %arg10[%22, %c0_13, %c0_14] : memref<1x4x256xf32, #tpu.memory_space<vmem>>, vector<1x4x256xf32>
      %24 = vector.shape_cast %23 : vector<1x4x256xf32> to vector<4x256xf32>
      %25 = vector.shape_cast %21 : vector<4x256xf32> to vector<1x4x256xf32>
      tpu.vector_store %arg10[%22, %c0_13, %c0_14], %25 {strides = array<i32>} : memref<1x4x256xf32, #tpu.memory_space<vmem>>, vector<1x4x256xf32>,
    } else {
    }
    %6 = arith.index_cast %arg1 : i32 to index
    %c0 = arith.constant 0 : index
    %c0_3 = arith.constant 0 : index
    %7 = vector.load %arg10[%6, %c0, %c0_3] : memref<1x4x256xf32, #tpu.memory_space<vmem>>, vector<1x4x256xf32>
    %8 = vector.shape_cast %7 : vector<1x4x256xf32> to vector<4x256xf32>
    %c0_4 = arith.constant 0 : index
    %c0_5 = arith.constant 0 : index
    %9 = vector.load %arg11[%c0_4, %c0_5] : memref<4x256xf32, #tpu.memory_space<vmem>>, vector<4x256xf32>
    %10 = arith.truncf %9 : vector<4x256xf32> to vector<4x256xbf16>
    %c0_6 = arith.constant 0 : index
    %c0_7 = arith.constant 0 : index
    %11 = vector.load %arg7[%c0_6, %c0_7] : memref<256x256xbf16, #tpu.memory_space<vmem>>, vector<256x256xbf16>
    %cst = arith.constant dense<0.000000e+00> : vector<4x256xf32>
    %12 = tpu.matmul %10, %11, %cst {dimension_numbers = #tpu.dot_dimension_numbers<[1], [0], [0], [1], [0, 0, 1, 1], [], []>} : vector<4x256xbf16>, vector<256x256xbf16>, vector<4x256xf32> -> vector<4x256xf32>
    %13 = arith.addf %8, %12 : vector<4x256xf32>
    %14 = arith.index_cast %arg1 : i32 to index
    %c0_8 = arith.constant 0 : index
    %c0_9 = arith.constant 0 : index
    %15 = vector.load %arg10[%14, %c0_8, %c0_9] : memref<1x4x256xf32, #tpu.memory_space<vmem>>, vector<1x4x256xf32>
    %16 = vector.shape_cast %15 : vector<1x4x256xf32> to vector<4x256xf32>
    %17 = vector.shape_cast %13 : vector<4x256xf32> to vector<1x4x256xf32>
    tpu.vector_store %arg10[%14, %c0_8, %c0_9], %17 {strides = array<i32>} : memref<1x4x256xf32, #tpu.memory_space<vmem>>, vector<1x4x256xf32>,
    %c0_i32_10 = arith.constant 0 : i32
    %18 = arith.cmpi eq, %arg0, %c0_i32_10 : i32
    %19 = arith.extui %18 : i1 to i32
    %c0_i32_11 = arith.constant 0 : i32
    %20 = arith.cmpi ne, %19, %c0_i32_11 : i32
    scf.if %20 {
      %21 = arith.index_cast %arg1 : i32 to index
      %c0_12 = arith.constant 0 : index
      %c0_13 = arith.constant 0 : index
      %22 = vector.load %arg10[%21, %c0_12, %c0_13] : memref<1x4x256xf32, #tpu.memory_space<vmem>>, vector<1x4x256xf32>
      %23 = vector.shape_cast %22 : vector<1x4x256xf32> to vector<4x256xf32>
      %c0_14 = arith.constant 0 : index
      %c0_15 = arith.constant 0 : index
      %24 = vector.load %arg8[%c0_14, %c0_15] : memref<1x256xf32, #tpu.memory_space<vmem>>, vector<1x256xf32>
      %25 = vector.broadcast %24 : vector<1x256xf32> to vector<4x256xf32>
      %26 = arith.addf %23, %25 : vector<4x256xf32>
      %27 = arith.negf %26 : vector<4x256xf32>
      %28 = math.exp %27 : vector<4x256xf32>
      %cst_16 = arith.constant 1.000000e+00 : f32
      %29 = vector.broadcast %cst_16 : f32 to vector<4x256xf32>
      %30 = arith.addf %29, %28 : vector<4x256xf32>
      %31 = arith.divf %29, %30 : vector<4x256xf32>
      %c0_17 = arith.constant 0 : index
      %c0_18 = arith.constant 0 : index
      %32 = vector.load %arg3[%c0_17, %c0_18] : memref<4x256xf32, #tpu.memory_space<vmem>>, vector<4x256xf32>
      %c0_19 = arith.constant 0 : index
      %c0_20 = arith.constant 0 : index
      %33 = vector.load %arg4[%c0_19, %c0_20] : memref<4x256xf32, #tpu.memory_space<vmem>>, vector<4x256xf32>
      %34 = arith.subf %32, %33 : vector<4x256xf32>
      %35 = arith.mulf %31, %34 : vector<4x256xf32>
      %36 = arith.addf %35, %33 : vector<4x256xf32>
      %c0_21 = arith.constant 0 : index
      %c0_22 = arith.constant 0 : index
      %37 = vector.load %arg9[%c0_21, %c0_22] : memref<4x256xf32, #tpu.memory_space<vmem>>, vector<4x256xf32>
      tpu.vector_store %arg9[%c0_21, %c0_22], %36 {strides = array<i32>} : memref<4x256xf32, #tpu.memory_space<vmem>>, vector<4x256xf32>,
    } else {
    }
    return
  }
  func.func @transform_0(%arg0: i32, %arg1: i32) -> (i32, i32) {
    %c0_i32 = arith.constant 0 : i32
    %c0_i32_0 = arith.constant 0 : i32
    %c0_i32_1 = arith.constant 0 : i32
    return %c0_i32, %c0_i32_0 : i32, i32
  }
  func.func @transform_1(%arg0: i32, %arg1: i32) -> (i32, i32) {
    %c0_i32 = arith.constant 0 : i32
    %c0_i32_0 = arith.constant 0 : i32
    return %c0_i32, %arg1 : i32, i32
  }
  func.func @transform_2(%arg0: i32, %arg1: i32) -> (i32, i32) {
    %c0_i32 = arith.constant 0 : i32
    %c0_i32_0 = arith.constant 0 : i32
    return %c0_i32, %arg1 : i32, i32
  }
  func.func @transform_3(%arg0: i32, %arg1: i32) -> (i32, i32) {
    %c0_i32 = arith.constant 0 : i32
    %c0_i32_0 = arith.constant 0 : i32
    return %c0_i32, %arg0 : i32, i32
  }
  func.func @transform_4(%arg0: i32, %arg1: i32) -> (i32, i32) {
    %c0_i32 = arith.constant 0 : i32
    %c0_i32_0 = arith.constant 0 : i32
    return %c0_i32, %arg0 : i32, i32
  }
  func.func @transform_5(%arg0: i32, %arg1: i32) -> (i32, i32) {
    %c0_i32 = arith.constant 0 : i32
    return %arg0, %arg1 : i32, i32
  }
  func.func @transform_6(%arg0: i32, %arg1: i32) -> (i32, i32) {
    %c0_i32 = arith.constant 0 : i32
    %c0_i32_0 = arith.constant 0 : i32
    return %c0_i32, %arg1 : i32, i32
  }
  func.func @transform_7(%arg0: i32, %arg1: i32) -> (i32, i32) {
    %c0_i32 = arith.constant 0 : i32
    %c0_i32_0 = arith.constant 0 : i32
    return %c0_i32, %arg1 : i32, i32
  }
}

</mosaic_0001>

<bundles_post_ra>
// kernel: tpu_custom_call.1
= control target key start
LH: loop header
LB: loop body
LE: loop exit
PB: predicated region body
PF: predicated region fallthrough
CT: control target
= control target key end

     0   :  { %12 = vsyncpa [#allocation5], 0  ;;  %s1372_s0 = inlined_call_operand.hbm [shape: bf16[4,512], index: 0, kind: input, shape index: {}]   ;;  %s1373_s1 = inlined_call_operand.hbm [shape: f32[4,256], index: 1, kind: input, shape index: {}]   ;;  %s1374_s2 = inlined_call_operand.hbm [shape: f32[4,256], index: 2, kind: input, shape index: {}]   ;;  %s1375_s3 = inlined_call_operand.hbm [shape: bf16[512,256], index: 3, kind: input, shape index: {}]   ;;  %s1376_s4 = inlined_call_operand.vmem [shape: f32[1,256], index: 4, kind: input, shape index: {}]   ;;  %s1377_s5 = inlined_call_operand.hbm [shape: bf16[256,256], index: 5, kind: input, shape index: {}]   ;;  %s1378_s6 = inlined_call_operand.vmem [shape: f32[1,256], index: 6, kind: input, shape index: {}]   ;;  %s1379_s7 = inlined_call_operand.hbm [shape: f32[4,256], index: 7, kind: output, shape index: {}]  }
   0x1   :  { %13 = vsyncpa [#allocation8], 0 }
   0x2   :  { %14 = vsyncpa [#allocation11], 0 }
   0x3   :  { %15 = vsyncpa [#allocation6], 0  ;;  %s1288_s24 = smov [#allocation7]   ;;  %s1289_s26 = smov [#allocation10]  }
   0x4   :  { %s32_s25 = sshll.u32 %s1288_s24, 4  ;;  %s51_s27 = sshll.u32 %s1289_s26, 4  ;;  %s33_s25 = int_to_ptr.vmem [resolvable:$true] %s32_s25  ;;  %s52_s27 = int_to_ptr.vmem [resolvable:$true] %s51_s27 }
   0x5   :  { %s1168_s28 = scalar_lea.vmem %s33_s25, 128  ;;  %p1173_p1 = scmp.lt.s32.totalorder %s33_s25, %s33_s25 }
   0x6   :  { %p1169_p0 = scmp.ne.s32.totalorder %s33_s25, %s1168_s28  ;;  %p1174_p2 = scmp.lt.s32.totalorder %s1168_s28, %s1168_s28 }
   0x8   :  { %p1175_p3 = por %p1174_p2, %p1173_p1 }
   0xa   :  { %p1176_p4 = pnand %p1175_p3, %p1169_p0 }
   0xc   :  { %1179 = shalt.err (!%p1176_p4)
}
   0xd   :  { %35 = dma.hbm_to_vmem [thread:$0]  %s1373_s1, 128, %s33_s25, [#allocation8]  }
   0xe   :  { %s1188_s8 = scalar_lea.vmem %s52_s27, 8192  ;;  %p1193_p6 = scmp.lt.s32.totalorder %s52_s27, %s52_s27 }
   0xf   :  { %p1189_p5 = scmp.ne.s32.totalorder %s52_s27, %s1188_s8  ;;  %p1194_p7 = scmp.lt.s32.totalorder %s1188_s8, %s1188_s8 }
  0x11   :  { %p1195_p8 = por %p1194_p7, %p1193_p6 }
  0x13   :  { %p1196_p9 = pnand %p1195_p8, %p1189_p5 }
  0x15   :  { %1199 = shalt.err (!%p1196_p9)
}
  0x16   :  { %s1290_s9 = smov 128   ;;  %s1291_s10 = smov 8  }
  0x17   :  { %57 = dma.hbm_to_vmem [thread:$0]  %s1375_s3, 8192, %s52_s27, [#allocation11], %s1290_s9, %s1290_s9, %s1291_s10  }
  0x18   :  { %s1292_s13 = smov [#allocation4]   ;;  %s1293_s15 = smov [#allocation9]  }
  0x19   :  { %s22_s14 = sshll.u32 %s1292_s13, 4  ;;  %s42_s1 = sshll.u32 %s1293_s15, 4  ;;  %s23_s14 = int_to_ptr.vmem [resolvable:$true] %s22_s14  ;;  %s43_s1 = int_to_ptr.vmem [resolvable:$true] %s42_s1 }
  0x1a   :  { %s1208_s16 = scalar_lea.vmem %s23_s14, 128  ;;  %p1213_p11 = scmp.lt.s32.totalorder %s23_s14, %s23_s14 }
  0x1b   :  { %p1209_p10 = scmp.ne.s32.totalorder %s23_s14, %s1208_s16  ;;  %p1214_p12 = scmp.lt.s32.totalorder %s1208_s16, %s1208_s16 }
  0x1d   :  { %p1215_p13 = por %p1214_p12, %p1213_p11 }
  0x1f   :  { %p1216_p0 = pnand %p1215_p13, %p1209_p10 }
  0x21   :  { %1219 = shalt.err (!%p1216_p0)
}
  0x22   :  { %25 = dma.hbm_to_vmem [thread:$0]  %s1372_s0, 128, %s23_s14, [#allocation5]  }
  0x23   :  { %s1228_s19 = scalar_lea.vmem %s43_s1, 128  ;;  %p1233_p2 = scmp.lt.s32.totalorder %s43_s1, %s43_s1 }
  0x24   :  { %p1229_p1 = scmp.ne.s32.totalorder %s43_s1, %s1228_s19  ;;  %p1234_p3 = scmp.lt.s32.totalorder %s1228_s19, %s1228_s19 }
  0x26   :  { %p1235_p4 = por %p1234_p3, %p1233_p2 }
  0x28   :  { %p1236_p5 = pnand %p1235_p4, %p1229_p1 }
  0x2a   :  { %1239 = shalt.err (!%p1236_p5)
}
  0x2b   :  { %45 = dma.hbm_to_vmem [thread:$0]  %s1374_s2, 128, %s43_s1, [#allocation8]  }
  0x2c   :  { %s1294_s21 = smov [#allocation12]  }
  0x2d   :  { %s65_s22 = sshll.u32 %s1294_s21, 4  ;;  %s66_s22 = int_to_ptr.vmem [resolvable:$true] %s65_s22 }
  0x2e   :  { %s1248_s23 = scalar_lea.vmem %s66_s22, 4096  ;;  %p1253_p7 = scmp.lt.s32.totalorder %s66_s22, %s66_s22 }
  0x2f   :  { %p1249_p6 = scmp.ne.s32.totalorder %s66_s22, %s1248_s23  ;;  %p1254_p8 = scmp.lt.s32.totalorder %s1248_s23, %s1248_s23 }
  0x31   :  { %p1255_p9 = por %p1254_p8, %p1253_p7 }
  0x33   :  { %p1256_p10 = pnand %p1255_p9, %p1249_p6 }
  0x35   :  { %1259 = shalt.err (!%p1256_p10)
}
  0x36   :  { %71 = dma.hbm_to_vmem [thread:$0]  %s1377_s5, 4096, %s66_s22, [#allocation11], %s1290_s9, %s1290_s9, %s1291_s10  }
  0x37   :  { %1280 = dma.done.wait [#allocation5], 128  }
  0x38   :  { %1281 = vsyncadd [#allocation5], 4294967168 }
  0x39   :  { %1282 = dma.done.wait [#allocation8], 256  }
  0x3a   :  { %1283 = vsyncadd [#allocation8], 4294967040 }
  0x3b   :  { %1284 = dma.done.wait [#allocation11], 12288  }
  0x3c   :  { %1285 = vsyncadd [#allocation11], 4294955008  ;;  %v1011_v0 = vld [vmem:[#allocation10 + $0x74] ss:$8 sps:$4 sm:$0xff]   ;;  %v1015_v2 = vld [vmem:[#allocation10 + $0x70] ss:$8 sps:$4 sm:$0xff]   ;;  %v160_v36 = vlaneseq }
  0x3d   :  { %v1013_v1 = vld [vmem:[#allocation10 + $0x174] ss:$8 sps:$4 sm:$0xff]   ;;  %512 = vmatprep.subr.bf16.mxu0 %v1011_v0  ;;  %v1016_v3 = vld [vmem:[#allocation10 + $0x170] ss:$8 sps:$4 sm:$0xff]   ;;  %v1017_v4 = vld [vmem:[#allocation10 + $0x64] ss:$8 sps:$4 sm:$0xff]  }
  0x3e   :  { %553 = vmatprep.subr.bf16.mxu1 %v1013_v1  ;;  %513 = vmatpush1.bf16.msra.mxu0 %v1015_v2  ;;  %v1019_v5 = vld [vmem:[#allocation10 + $0x164] ss:$8 sps:$4 sm:$0xff]   ;;  %v1021_v6 = vld [vmem:[#allocation10 + $0x60] ss:$8 sps:$4 sm:$0xff]   ;;  %v1023_v8 = vld [vmem:[#allocation10 + $0x54] ss:$8 sps:$4 sm:$0xff]  }
  0x3f   :  { %554 = vmatpush1.bf16.msra.mxu1 %v1016_v3  ;;  %514 = vmatprep.subr.bf16.mxu0 %v1017_v4  ;;  %v1022_v7 = vld [vmem:[#allocation10 + $0x160] ss:$8 sps:$4 sm:$0xff]   ;;  %v1025_v9 = vld [vmem:[#allocation10 + $0x154] ss:$8 sps:$4 sm:$0xff]   ;;  %v1027_v10 = vld [vmem:[#allocation10 + $0x50] ss:$8 sps:$4 sm:$0xff]  }
  0x40   :  { %555 = vmatprep.subr.bf16.mxu1 %v1019_v5  ;;  %v1028_v11 = vld [vmem:[#allocation10 + $0x150] ss:$8 sps:$4 sm:$0xff]   ;;  %v1029_v12 = vld [vmem:[#allocation10 + $0x44] ss:$8 sps:$4 sm:$0xff]   ;;  %v1033_v14 = vld [vmem:[#allocation10 + $0x40] ss:$8 sps:$4 sm:$0xff]  }
  0x41   :  { %v1031_v13 = vld [vmem:[#allocation10 + $0x144] ss:$8 sps:$4 sm:$0xff]   ;;  %v1034_v15 = vld [vmem:[#allocation10 + $0x140] ss:$8 sps:$4 sm:$0xff]   ;;  %v1035_v16 = vld [vmem:[#allocation10 + $0x34] ss:$8 sps:$4 sm:$0xff]  }
  0x42   :  { %515 = vmatpush1.bf16.msra.mxu0 %v1021_v6  ;;  %v1037_v17 = vld [vmem:[#allocation10 + $0x134] ss:$8 sps:$4 sm:$0xff]   ;;  %v1039_v18 = vld [vmem:[#allocation10 + $0x30] ss:$8 sps:$4 sm:$0xff]   ;;  %v1041_v20 = vld [vmem:[#allocation10 + $0x24] ss:$8 sps:$4 sm:$0xff]  }
  0x43   :  { %556 = vmatpush1.bf16.msra.mxu1 %v1022_v7  ;;  %516 = vmatprep.subr.bf16.mxu0 %v1023_v8  ;;  %v1040_v19 = vld [vmem:[#allocation10 + $0x130] ss:$8 sps:$4 sm:$0xff]   ;;  %v1043_v21 = vld [vmem:[#allocation10 + $0x124] ss:$8 sps:$4 sm:$0xff]   ;;  %v1045_v22 = vld [vmem:[#allocation10 + $0x20] ss:$8 sps:$4 sm:$0xff]  }
  0x44   :  { %557 = vmatprep.subr.bf16.mxu1 %v1025_v9  ;;  %v1046_v23 = vld [vmem:[#allocation10 + $0x120] ss:$8 sps:$4 sm:$0xff]   ;;  %v1047_v24 = vld [vmem:[#allocation10 + $0x14] ss:$8 sps:$4 sm:$0xff]   ;;  %v1051_v26 = vld [vmem:[#allocation10 + $0x10] ss:$8 sps:$4 sm:$0xff]  }
  0x45   :  { %v1049_v25 = vld [vmem:[#allocation10 + $0x114] ss:$8 sps:$4 sm:$0xff]   ;;  %v1052_v27 = vld [vmem:[#allocation10 + $0x110] ss:$8 sps:$4 sm:$0xff]   ;;  %v1053_v28 = vld [vmem:[#allocation10 + $0x4] ss:$8 sps:$4 sm:$0xff]  }
  0x46   :  { %517 = vmatpush1.bf16.msra.mxu0 %v1027_v10  ;;  %v1055_v29 = vld [vmem:[#allocation10 + $0x104] ss:$8 sps:$4 sm:$0xff]   ;;  %v1057_v30 = vld [vmem:[#allocation10] ss:$8 sps:$4 sm:$0xff]   ;;  %v1059_v32 = vld [vmem:[#allocation10 + $0xf4] ss:$8 sps:$4 sm:$0xff]  }
  0x47   :  { %558 = vmatpush1.bf16.msra.mxu1 %v1028_v11  ;;  %518 = vmatprep.subr.bf16.mxu0 %v1029_v12  ;;  %v1058_v31 = vld [vmem:[#allocation10 + $0x100] ss:$8 sps:$4 sm:$0xff]   ;;  %v1061_v33 = vld [vmem:[#allocation10 + $0x1f4] ss:$8 sps:$4 sm:$0xff]   ;;  %v1063_v34 = vld [vmem:[#allocation10 + $0xf0] ss:$8 sps:$4 sm:$0xff]  }
  0x48   :  { %559 = vmatprep.subr.bf16.mxu1 %v1031_v13  ;;  %v1064_v35 = vld [vmem:[#allocation10 + $0x1f0] ss:$8 sps:$4 sm:$0xff]   ;;  %v1295_v37 = vmov 1983009808   ;;  %v1065_v39 = vld [vmem:[#allocation10 + $0xe4] ss:$8 sps:$4 sm:$0xff]  }
  0x49   :  { %v173_v38 = vunpack.c.l.s4 %v1295_v37  ;;  %v1067_v40 = vld [vmem:[#allocation10 + $0x1e4] ss:$8 sps:$4 sm:$0xff]   ;;  %v1069_v41 = vld [vmem:[#allocation10 + $0xe0] ss:$8 sps:$4 sm:$0xff]   ;;  %v1358_v42 = vshrl.u32 %v160_v36, 7  ;;  %s1296_s26 = smov [#allocation13]  }
  0x4a   :  { %519 = vmatpush1.bf16.msra.mxu0 %v1033_v14  ;;  %v1070_v44 = vld [vmem:[#allocation10 + $0x1e0] ss:$8 sps:$4 sm:$0xff]   ;;  %v1071_v45 = vld [vmem:[#allocation10 + $0xd4] ss:$8 sps:$4 sm:$0xff]   ;;  %v1075_v47 = vld [vmem:[#allocation10 + $0xd0] ss:$8 sps:$4 sm:$0xff]  }
  0x4b   :  { %560 = vmatpush1.bf16.msra.mxu1 %v1034_v15  ;;  %520 = vmatprep.subr.bf16.mxu0 %v1035_v16  ;;  %v174_v43 = vunpack.c.0.s8 %v173_v38  ;;  %v1073_v46 = vld [vmem:[#allocation10 + $0x1d4] ss:$8 sps:$4 sm:$0xff]   ;;  %v1076_v48 = vld [vmem:[#allocation10 + $0x1d0] ss:$8 sps:$4 sm:$0xff]   ;;  %v1077_v50 = vld [vmem:[#allocation10 + $0xc4] ss:$8 sps:$4 sm:$0xff]  }
  0x4c   :  { %561 = vmatprep.subr.bf16.mxu1 %v1037_v17  ;;  %v1079_v51 = vld [vmem:[#allocation10 + $0x1c4] ss:$8 sps:$4 sm:$0xff]   ;;  %v1081_v53 = vld [vmem:[#allocation10 + $0xc0] ss:$8 sps:$4 sm:$0xff]   ;;  %v1083_v57 = vld [vmem:[#allocation10 + $0xb4] ss:$8 sps:$4 sm:$0xff]  }
  0x4d   :  { %v177_v49 = vsub.s32 %v174_v43, %v1358_v42  ;;  %v93_v52 = vld [vmem:[#allocation4] sm:$0xff]  ;;  %v1085_v58 = vld [vmem:[#allocation10 + $0x1b4] ss:$8 sps:$4 sm:$0xff]   ;;  %v1087_v61 = vld [vmem:[#allocation10 + $0xb0] ss:$8 sps:$4 sm:$0xff]  }
  0x4e   :  { %521 = vmatpush1.bf16.msra.mxu0 %v1039_v18  ;;  %v171_v55 = vcombine.high %v93_v52, %v93_v52  ;;  %v1082_v56 = vld [vmem:[#allocation10 + $0x1c0] ss:$8 sps:$4 sm:$0xff]   ;;  %v1088_v63 = vld [vmem:[#allocation10 + $0x1b0] ss:$8 sps:$4 sm:$0xff]   ;;  %v1089_v0 = vld [vmem:[#allocation10 + $0xa4] ss:$8 sps:$4 sm:$0xff]  }
  0x4f   :  { %562 = vmatpush1.bf16.msra.mxu1 %v1040_v19  ;;  %522 = vmatprep.subr.bf16.mxu0 %v1041_v20  ;;  %v178_v54 = vrot.slane %v93_v52, %v177_v49  ;;  %v1091_v1 = vld [vmem:[#allocation10 + $0x1a4] ss:$8 sps:$4 sm:$0xff]   ;;  %v1093_v2 = vld [vmem:[#allocation10 + $0xa0] ss:$8 sps:$4 sm:$0xff]   ;;  %v1095_v4 = vld [vmem:[#allocation10 + $0x94] ss:$8 sps:$4 sm:$0xff]  }
  0x50   :  { %563 = vmatprep.subr.bf16.mxu1 %v1043_v21  ;;  %v185_v60 = vrot.slane %v171_v55, %v177_v49  ;;  %v1094_v3 = vld [vmem:[#allocation10 + $0x1a0] ss:$8 sps:$4 sm:$0xff]   ;;  %v1097_v5 = vld [vmem:[#allocation10 + $0x194] ss:$8 sps:$4 sm:$0xff]   ;;  %v1099_v6 = vld [vmem:[#allocation10 + $0x90] ss:$8 sps:$4 sm:$0xff]  }
  0x51   :  { %v186_v59 = vcombine.high %v178_v54, %v178_v54  ;;  %v1100_v7 = vld [vmem:[#allocation10 + $0x190] ss:$8 sps:$4 sm:$0xff]   ;;  %v1101_v8 = vld [vmem:[#allocation10 + $0x84] ss:$8 sps:$4 sm:$0xff]   ;;  %v1105_v10 = vld [vmem:[#allocation10 + $0x80] ss:$8 sps:$4 sm:$0xff]  }
  0x52   :  { %523 = vmatpush1.bf16.msra.mxu0 %v1045_v22  ;;  %v187_v62 = vcombine.high %v185_v60, %v185_v60  ;;  %v1103_v9 = vld [vmem:[#allocation10 + $0x184] ss:$8 sps:$4 sm:$0xff]   ;;  %v1106_v11 = vld [vmem:[#allocation10 + $0x180] ss:$8 sps:$4 sm:$0xff]   ;;  %v1110_v12 = vld [vmem:[#allocation12 + $0x74] ss:$8 sps:$4 sm:$0xff]  }
  0x53   :  { %564 = vmatpush1.bf16.msra.mxu1 %v1046_v23  ;;  %524 = vmatprep.subr.bf16.mxu0 %v1047_v24  ;;  %v1108_v13 = vld [vmem:[#allocation12 + $0x70] ss:$8 sps:$4 sm:$0xff]   ;;  %v1113_v14 = vld [vmem:[#allocation12 + $0x64] ss:$8 sps:$4 sm:$0xff]   ;;  %v1111_v15 = vld [vmem:[#allocation12 + $0x60] ss:$8 sps:$4 sm:$0xff]  }
  0x54   :  { %565 = vmatprep.subr.bf16.mxu1 %v1049_v25  ;;  %544 = vmatprep.mubr.bf16.mxu0 %v186_v59  ;;  %v1116_v16 = vld [vmem:[#allocation12 + $0x54] ss:$8 sps:$4 sm:$0xff]   ;;  %v1114_v17 = vld [vmem:[#allocation12 + $0x50] ss:$8 sps:$4 sm:$0xff]   ;;  %v1119_v18 = vld [vmem:[#allocation12 + $0x44] ss:$8 sps:$4 sm:$0xff]  }
  0x55   :  { %585 = vmatprep.mubr.bf16.mxu1 %v187_v62  ;;  %v1117_v19 = vld [vmem:[#allocation12 + $0x40] ss:$8 sps:$4 sm:$0xff]   ;;  %v1122_v20 = vld [vmem:[#allocation12 + $0x34] ss:$8 sps:$4 sm:$0xff]   ;;  %v1120_v21 = vld [vmem:[#allocation12 + $0x30] ss:$8 sps:$4 sm:$0xff]  }
  0x56   :  { %525 = vmatpush1.bf16.msra.mxu0 %v1051_v26  ;;  %v1125_v22 = vld [vmem:[#allocation12 + $0x24] ss:$8 sps:$4 sm:$0xff]   ;;  %v1123_v23 = vld [vmem:[#allocation12 + $0x20] ss:$8 sps:$4 sm:$0xff]   ;;  %v1128_v24 = vld [vmem:[#allocation12 + $0x14] ss:$8 sps:$4 sm:$0xff]  }
  0x57   :  { %566 = vmatpush1.bf16.msra.mxu1 %v1052_v27  ;;  %526 = vmatprep.subr.bf16.mxu0 %v1053_v28  ;;  %v1126_v25 = vld [vmem:[#allocation12 + $0x10] ss:$8 sps:$4 sm:$0xff]   ;;  %v1131_v26 = vld [vmem:[#allocation12 + $0x4] ss:$8 sps:$4 sm:$0xff]   ;;  %v1129_v27 = vld [vmem:[#allocation12] ss:$8 sps:$4 sm:$0xff]  }
  0x58   :  { %567 = vmatprep.subr.bf16.mxu1 %v1055_v29  ;;  %v1134_v28 = vld [vmem:[#allocation12 + $0xf4] ss:$8 sps:$4 sm:$0xff]   ;;  %v1132_v29 = vld [vmem:[#allocation12 + $0xf0] ss:$8 sps:$4 sm:$0xff]   ;;  %v1149_v38 = vld [vmem:[#allocation12 + $0xa4] ss:$8 sps:$4 sm:$0xff]  }
  0x59   :  { %v1146_v36 = vld [vmem:[#allocation12 + $0xb4] ss:$8 sps:$4 sm:$0xff]   ;;  %v1144_v37 = vld [vmem:[#allocation12 + $0xb0] ss:$8 sps:$4 sm:$0xff]   ;;  %v1155_v43 = vld [vmem:[#allocation12 + $0x84] ss:$8 sps:$4 sm:$0xff]  }
  0x5a   :  { %527 = vmatpush1.bf16.msra.mxu0 %v1057_v30  ;;  %v1137_v30 = vld [vmem:[#allocation12 + $0xe4] ss:$8 sps:$4 sm:$0xff]  }
  0x5b   :  { %568 = vmatpush1.bf16.msra.mxu1 %v1058_v31  ;;  %528 = vmatprep.subr.bf16.mxu0 %v1059_v32  ;;  %v1135_v31 = vld [vmem:[#allocation12 + $0xe0] ss:$8 sps:$4 sm:$0xff]   ;;  %v1140_v32 = vld [vmem:[#allocation12 + $0xd4] ss:$8 sps:$4 sm:$0xff]  }
  0x5c   :  { %569 = vmatprep.subr.bf16.mxu1 %v1061_v33  ;;  %v1138_v33 = vld [vmem:[#allocation12 + $0xd0] ss:$8 sps:$4 sm:$0xff]  }
  0x5e   :  { %529 = vmatpush2.bf16.msra.mxu0 %v1063_v34  ;;  %v1143_v34 = vld [vmem:[#allocation12 + $0xc4] ss:$8 sps:$4 sm:$0xff]  }
  0x5f   :  { %570 = vmatpush2.bf16.msra.mxu1 %v1064_v35  ;;  %530 = vmatprep.subr.bf16.mxu0 %v1065_v39  ;;  %v1141_v35 = vld [vmem:[#allocation12 + $0xc0] ss:$8 sps:$4 sm:$0xff]  }
  0x60   :  { %571 = vmatprep.subr.bf16.mxu1 %v1067_v40  ;;  %v1147_v39 = vld [vmem:[#allocation12 + $0xa0] ss:$8 sps:$4 sm:$0xff]   ;;  %v1152_v40 = vld [vmem:[#allocation12 + $0x94] ss:$8 sps:$4 sm:$0xff]  }
  0x62   :  { %531 = vmatpush2.bf16.msra.mxu0 %v1069_v41  ;;  %v1150_v41 = vld [vmem:[#allocation12 + $0x90] ss:$8 sps:$4 sm:$0xff]  }
  0x63   :  { %572 = vmatpush2.bf16.msra.mxu1 %v1070_v44  ;;  %532 = vmatprep.subr.bf16.mxu0 %v1071_v45  ;;  %v1153_v44 = vld [vmem:[#allocation12 + $0x80] ss:$8 sps:$4 sm:$0xff]   ;;  %v162_v45 = vsub.s32 0, %v1358_v42 }
  0x64   :  { %573 = vmatprep.subr.bf16.mxu1 %v1073_v46  ;;  %v158_v46 = vld [vmem:[%s1376_s4] sm:$0x3] }
  0x66   :  { %533 = vmatpush2.bf16.msra.mxu0 %v1075_v47  ;;  %v166_v47 = vsub.s32 1, %v1358_v42 }
  0x67   :  { %574 = vmatpush2.bf16.msra.mxu1 %v1076_v48  ;;  %534 = vmatprep.subr.bf16.mxu0 %v1077_v50  ;;  %v163_v48 = vrot.slane %v158_v46, %v162_v45 }
  0x68   :  { %575 = vmatprep.subr.bf16.mxu1 %v1079_v51  ;;  %v167_v49 = vrot.slane %v158_v46, %v166_v47 }
  0x6a   :  { %535 = vmatpush2.bf16.msra.mxu0 %v1081_v53 }
  0x6b   :  { %576 = vmatpush2.bf16.msra.mxu1 %v1082_v56  ;;  %536 = vmatprep.subr.bf16.mxu0 %v1083_v57 }
  0x6c   :  { %577 = vmatprep.subr.bf16.mxu1 %v1085_v58 }
  0x6e   :  { %537 = vmatpush2.bf16.msra.mxu0 %v1087_v61 }
  0x6f   :  { %578 = vmatpush2.bf16.msra.mxu1 %v1088_v63  ;;  %538 = vmatprep.subr.bf16.mxu0 %v1089_v0 }
  0x70   :  { %579 = vmatprep.subr.bf16.mxu1 %v1091_v1 }
  0x72   :  { %539 = vmatpush2.bf16.msra.mxu0 %v1093_v2 }
  0x73   :  { %580 = vmatpush2.bf16.msra.mxu1 %v1094_v3  ;;  %540 = vmatprep.subr.bf16.mxu0 %v1095_v4  ;;  %v862_v3 = vld [vmem:[%s1378_s6] sm:$0x3]  ;;  %s893_s6 = sshll.u32 %s1296_s26, 4  ;;  %s894_s6 = int_to_ptr.vmem [resolvable:$true] %s893_s6 }
  0x74   :  { %581 = vmatprep.subr.bf16.mxu1 %v1097_v5  ;;  %v867_v4 = vrot.slane %v862_v3, %v162_v45  ;;  %v871_v5 = vrot.slane %v862_v3, %v166_v47  ;;  %s1260_s27 = scalar_lea.vmem %s894_s6, 128  ;;  %p1265_p12 = scmp.lt.s32.totalorder %s894_s6, %s894_s6 }
  0x75   :  { %p1261_p11 = scmp.ne.s32.totalorder %s894_s6, %s1260_s27  ;;  %p1266_p13 = scmp.lt.s32.totalorder %s1260_s27, %s1260_s27 }
  0x76   :  { %541 = vmatpush2.bf16.msra.mxu0 %v1099_v6 }
  0x77   :  { %582 = vmatpush2.bf16.msra.mxu1 %v1100_v7  ;;  %542 = vmatprep.subr.bf16.mxu0 %v1101_v8  ;;  %v872_v7 = vcombine.low %v867_v4, %v871_v5  ;;  %p1267_p0 = por %p1266_p13, %p1265_p12 }
  0x78   :  { %583 = vmatprep.subr.bf16.mxu1 %v1103_v9 }
  0x79   :  { %p1268_p1 = pnand %p1267_p0, %p1261_p11 }
  0x7a   :  { %543 = vmatpush2.bf16.msra.mxu0 %v1105_v10 }
  0x7b   :  { %584 = vmatpush2.bf16.msra.mxu1 %v1106_v11  ;;  %811 = vmatprep.subr.bf16.mxu0 %v1110_v12 }
  0x7d   :  { %545 = vmatmul.mubr.bf16.vlgmr.msra.gmra.mxu0 %v178_v54 }
  0x7e   :  { %586 = vmatmul.mubr.bf16.vlgmr.msra.gmra.mxu1 %v185_v60  ;;  %812 = vmatpush1.bf16.msra.mxu0 %v1108_v13 }
  0x7f   :  { %813 = vmatprep.subr.bf16.mxu0 %v1113_v14 }
  0x82   :  { %814 = vmatpush1.bf16.msra.mxu0 %v1111_v15 }
  0x83   :  { %815 = vmatprep.subr.bf16.mxu0 %v1116_v16  ;;  %v881_v16 = vld [vmem:[#allocation7] sm:$0xff] }
  0x86   :  { %816 = vmatpush1.bf16.msra.mxu0 %v1114_v17  ;;  %v882_v17 = vld [vmem:[#allocation9] sm:$0xff] }
  0x87   :  { %817 = vmatprep.subr.bf16.mxu0 %v1119_v18  ;;  %v883_v18 = vsub.f32 %v881_v16, %v882_v17 }
  0x8a   :  { %818 = vmatpush1.bf16.msra.mxu0 %v1117_v19 }
  0x8b   :  { %819 = vmatprep.subr.bf16.mxu0 %v1122_v20 }
  0x8e   :  { %820 = vmatpush1.bf16.msra.mxu0 %v1120_v21 }
  0x8f   :  { %821 = vmatprep.subr.bf16.mxu0 %v1125_v22 }
  0x92   :  { %822 = vmatpush1.bf16.msra.mxu0 %v1123_v23 }
  0x93   :  { %823 = vmatprep.subr.bf16.mxu0 %v1128_v24 }
  0x96   :  { %824 = vmatpush1.bf16.msra.mxu0 %v1126_v25 }
  0x97   :  { %825 = vmatprep.subr.bf16.mxu0 %v1131_v26 }
  0x9a   :  { %826 = vmatpush1.bf16.msra.mxu0 %v1129_v27 }
  0x9b   :  { %827 = vmatprep.subr.bf16.mxu0 %v1134_v28 }
  0x9e   :  { %828 = vmatpush2.bf16.msra.mxu0 %v1132_v29 }
  0x9f   :  { %829 = vmatprep.subr.bf16.mxu0 %v1137_v30 }
  0xa2   :  { %830 = vmatpush2.bf16.msra.mxu0 %v1135_v31 }
  0xa3   :  { %831 = vmatprep.subr.bf16.mxu0 %v1140_v32 }
  0xa6   :  { %832 = vmatpush2.bf16.msra.mxu0 %v1138_v33 }
  0xa7   :  { %833 = vmatprep.subr.bf16.mxu0 %v1143_v34 }
  0xaa   :  { %834 = vmatpush2.bf16.msra.mxu0 %v1141_v35 }
  0xab   :  { %835 = vmatprep.subr.bf16.mxu0 %v1146_v36 }
  0xae   :  { %836 = vmatpush2.bf16.msra.mxu0 %v1144_v37 }
  0xaf   :  { %837 = vmatprep.subr.bf16.mxu0 %v1149_v38 }
  0xb2   :  { %838 = vmatpush2.bf16.msra.mxu0 %v1147_v39 }
  0xb3   :  { %839 = vmatprep.subr.bf16.mxu0 %v1152_v40 }
  0xb6   :  { %840 = vmatpush2.bf16.msra.mxu0 %v1150_v41 }
  0xb7   :  { %841 = vmatprep.subr.bf16.mxu0 %v1155_v43 }
  0xba   :  { %842 = vmatpush2.bf16.msra.mxu0 %v1153_v44 }
 0x13d   :  { %v546_v50 = vpop.f32.mrf.mxu0 }
 0x13e   :  { %v587_v51 = vpop.f32.mrf.mxu1  ;;  %v547_v52 = vadd.f32 %v546_v50, %v163_v48 }
 0x13f   :  { %v548_v53 = vpop.f32.mrf.mxu0 }
 0x140   :  { %v589_v54 = vpop.f32.mrf.mxu1  ;;  %v588_v55 = vadd.f32 %v587_v51, %v547_v52  ;;  %v549_v56 = vadd.f32 %v548_v53, %v167_v49 }
 0x141   :  { %v550_v57 = vpop.f32.mrf.mxu0 }
 0x142   :  { %v591_v58 = vpop.f32.mrf.mxu1  ;;  %v590_v59 = vadd.f32 %v589_v54, %v549_v56  ;;  %v594_v62 = vmax.f32 %v588_v55, 0.0 }
 0x143   :  { %v551_v60 = vpop.f32.mrf.mxu0 }
 0x144   :  { %v592_v61 = vpop.f32.mrf.mxu1  ;;  %v595_v63 = vmax.f32 %v590_v59, 0.0 }
 0x146   :  { %v598_v0 = vcombine.low %v594_v62, %v595_v63  ;;  %v1001_v1 = vcombine.low %v595_v63, %v595_v63 }
 0x148   :  { %v617_v2 = vpack.c.bf16 %v598_v0, %v598_v0  ;;  %v618_v42 = vpack.c.bf16 %v1001_v1, %v1001_v1 }
 0x14a   :  { %843 = vmatprep.mubr.bf16.mxu0 %v618_v42 }
 0x14b   :  { %844 = vmatmul.mubr.bf16.vlgmr.msra.gmra.mxu0 %v617_v2 }
 0x20b   :  { %v845_v6 = vpop.f32.mrf.mxu0 }
 0x20d   :  { %v847_v8 = vpop.f32.mrf.mxu0 }
 0x20e   :  { %v854_v9 = vcombine.low %v845_v6, %v847_v8 }
 0x20f   :  { %v849_v10 = vpop.f32.mrf.mxu0 }
 0x210   :  { %v874_v11 = vadd.f32 %v872_v7, %v854_v9 }
 0x211   :  { %v850_v12 = vpop.f32.mrf.mxu0 }
 0x212   :  { %v1000_v13 = vmul.f32 -1.442695, %v874_v11 }
 0x214   :  { %1156 = vpow2.f32 %v1000_v13 }
 0x221   :  { %v1157_v14 = vpop.eup %1156 }
 0x222   :  { %v878_v15 = vadd.f32 1.0, %v1157_v14 }
 0x224   :  { %1158 = vrcp.f32 %v878_v15 }
 0x231   :  { %v1159_v19 = vpop.eup %1158 }
 0x232   :  { %v884_v20 = vmul.f32 %v1159_v19, %v883_v18 }
 0x234   :  { %v885_v21 = vadd.f32 %v884_v20, %v882_v17 }
 0x236   :  { %886 = vst [vmem:[#allocation13] sm:$0xff] %v885_v21 }
 0x237   :  { %1271 = shalt.err (!%p1268_p1)
}
 0x238   :  { %896 = dma.vmem_to_hbm [thread:$0]  %s894_s6, 128, %s1379_s7, [#allocation6]  }
 0x239   :  { %1286 = dma.done.wait [#allocation6], 128  }
 0x23a   :  { %1287 = vsyncadd [#allocation6], 4294967168 }
 0x23b   :  { %900 = vsyncpa [#allocation5], 1 }
 0x23c   :  { %901 = vsyncpa [#allocation8], 1 }
 0x23d   :  { %902 = vsyncpa [#allocation11], 1 }
 0x23e   :  { %903 = vsyncpa [#allocation6], 1 }

</bundles_post_ra>
